<compile_context>
chip_gen: v6e
topology: v6e:2x2x1
jax: 0.10.0
libtpu: 0.0.40
codegen_flags: <defaults>
</compile_context>

<pallas_src>
import jax
import jax.numpy as jnp
from jax.experimental import pallas as pl
from jax.experimental.pallas import tpu as pltpu


def _normalization_kernel(scale_ref, bias_ref, img_ref, out_ref):
    # scale_ref / bias_ref: VMEM (br, 1) f32 — per-row (i.e. per (n, c)) factors
    # img_ref / out_ref:    VMEM (br, bl) tile of the (N*C, H*W) slab
    x = img_ref[...].astype(jnp.float32)
    out_ref[...] = (x * scale_ref[...] + bias_ref[...]).astype(out_ref.dtype)


def _choose_blocks(num_rows, num_lanes, itemsize,
                   target_bytes=2 << 20,       # ~2 MiB/block: near-roofline, and
                                               # 4x double-buffered < v5e 16 MiB default
                   min_steps=8,                # >= 4 steps per v7x TensorCore
                   min_block_bytes=256 << 10,  # never shrink below this for step count
                   max_rows=1024):             # keep lane-padded (br,1) cols small
    """Pick a (row, lane) block for the 2-D grid over the (R, L) slab."""
    sub = 8 * max(1, 4 // itemsize)            # sublane packing: 8 f32 / 16 bf16 / 32 i8
    LANE = 128

    # Lane block: prefer the full lane extent (no ragged interior blocks) when
    # `sub` rows of it fit the budget; otherwise chunk into 128-multiples so a
    # tiny-R / huge-HW image still tiles instead of collapsing into one block.
    if num_lanes <= LANE or num_lanes * sub * itemsize <= target_bytes:
        bl = num_lanes
    else:
        bl = max(LANE, (target_bytes // (sub * itemsize)) // LANE * LANE)
        bl = min(bl, (num_lanes // LANE) * LANE)

    # Row block: full extent when tiny (legal as full-dim block), else a
    # packing-aligned multiple that fills the per-step budget.
    if num_rows <= sub:
        br = num_rows
    else:
        br = max(sub, (target_bytes // (bl * itemsize)) // sub * sub)
        br = min(br, (num_rows // sub) * sub, max_rows)

    # Guarantee enough grid steps for pipelining / megacore sharding when the
    # data is large enough to care.
    def steps(r, l):
        return pl.cdiv(num_rows, r) * pl.cdiv(num_lanes, l)

    while steps(br, bl) < min_steps and br * bl * itemsize > min_block_bytes:
        if br > sub:                            # shrink rows first (stay lane-dense)
            br = max(sub, (br // 2) // sub * sub)
        elif bl > LANE:
            bl = max(LANE, (bl // 2) // LANE * LANE)
        else:
            break
    return br, bl


def normalization(img, mean, std, *, donate_img=False):
    """(img - mean[:, None, None]) / std[:, None, None]; img is NCHW."""
    N, C, H, W = img.shape
    mean = jnp.asarray(mean)
    std = jnp.asarray(std)
    assert mean.shape == (C,) and std.shape == (C,)

    R, L = N * C, H * W
    itemsize = img.dtype.itemsize

    # Fold (x - m) / s  ->  x * (1/s) + (-m/s), precomputed over C elements.
    inv_std = (1.0 / std).astype(jnp.float32)
    neg_mean_over_std = (-mean.astype(jnp.float32)) * inv_std
    scale_rows = jnp.tile(inv_std, N).reshape(R, 1)            # (R, 1) f32
    bias_rows = jnp.tile(neg_mean_over_std, N).reshape(R, 1)   # (R, 1) f32

    x2d = img.reshape(R, L)                                    # lane axis = H*W
    br, bl = _choose_blocks(R, L, itemsize)
    grid = (pl.cdiv(R, br), pl.cdiv(L, bl))                    # lane axis innermost

    cost = pl.CostEstimate(
        flops=2 * R * L,
        transcendentals=0,
        bytes_accessed=2 * R * L * itemsize + 2 * R * 4,
    )

    out2d = pl.pallas_call(
        _normalization_kernel,
        out_shape=jax.ShapeDtypeStruct((R, L), img.dtype),
        grid=grid,
        in_specs=[
            # Block index depends only on the outer row axis -> the pipeline
            # re-issues these tiny DMAs only when the row block changes.
            pl.BlockSpec((br, 1), lambda i, j: (i, 0)),   # scale rows
            pl.BlockSpec((br, 1), lambda i, j: (i, 0)),   # bias rows
            pl.BlockSpec((br, bl), lambda i, j: (i, j)),  # image tile
        ],
        out_specs=pl.BlockSpec((br, bl), lambda i, j: (i, j)),
        compiler_params=pltpu.CompilerParams(
            dimension_semantics=("parallel", "parallel"),
            # Explicit budget: <= physical VMEM on every generation (v7x: 64 MiB)
            # and comfortably above our ~10 MiB worst-case double-buffered usage.
            vmem_limit_bytes=32 * 1024 * 1024,
        ),
        cost_estimate=cost,
        input_output_aliases={2: 0} if donate_img else {},
    )(scale_rows, bias_rows, x2d)

    return out2d.reshape(N, C, H, W)


if __name__ == "__main__":
    key = jax.random.PRNGKey(0)
    key, key2 = jax.random.split(key)

    # Case 1: ImageNet-style per-channel stats extended to C=4, small NCHW image.
    C = 4
    mean = jnp.array([0.485, 0.456, 0.406, 0.5], dtype=jnp.float32)
    std = jnp.array([0.229, 0.224, 0.225, 0.25], dtype=jnp.float32)
    img = jax.random.uniform(key, (2, C, 16, 16), dtype=jnp.float32)   # NCHW

    out = jax.block_until_ready(normalization(img, mean, std))
    ref = (img - mean[None, :, None, None]) / std[None, :, None, None]
    assert out.shape == img.shape and out.dtype == img.dtype
    assert jnp.allclose(out, ref, atol=1e-5, rtol=1e-5)

    # Case 2: N*C < 8 and non-128-multiple spatial size (exercises full-dim /
    # ragged block paths that the 2-D tiler must keep legal).
    mean3 = jnp.array([0.485, 0.456, 0.406], dtype=jnp.float32)
    std3 = jnp.array([0.229, 0.224, 0.225], dtype=jnp.float32)
    img3 = jax.random.uniform(key2, (1, 3, 20, 20), dtype=jnp.float32)

    out3 = jax.block_until_ready(normalization(img3, mean3, std3))
    ref3 = (img3 - mean3[None, :, None, None]) / std3[None, :, None, None]
    assert out3.shape == img3.shape and out3.dtype == img3.dtype
    assert jnp.allclose(out3, ref3, atol=1e-5, rtol=1e-5)

    print("KERNEL_OK")
</pallas_src>

<mosaic_0001>
module attributes {stable_mosaic.version = 11 : i64} {
  func.func @_normalization_kernel(%arg0: i32, %arg1: i32, %arg2: memref<8x1xf32, #tpu.memory_space<vmem>>, %arg3: memref<8x1xf32, #tpu.memory_space<vmem>>, %arg4: memref<8x256xf32, #tpu.memory_space<vmem>>, %arg5: memref<8x256xf32, #tpu.memory_space<vmem>>) attributes {dimension_semantics = [#tpu.dimension_semantics<parallel>, #tpu.dimension_semantics<parallel>], iteration_bounds = array<i64: 1, 1>, scalar_prefetch = 0 : i64, scratch_operands = 0 : i64, tpu.core_type = #tpu.core_type<tc>, window_params = [{transform_indices = @transform_0, window_bounds = array<i64: 8, 1>}, {transform_indices = @transform_1, window_bounds = array<i64: 8, 1>}, {transform_indices = @transform_2, window_bounds = array<i64: 8, 256>}, {transform_indices = @transform_3, window_bounds = array<i64: 8, 256>}]} {
    %c0 = arith.constant 0 : index
    %c0_0 = arith.constant 0 : index
    %0 = vector.load %arg4[%c0, %c0_0] : memref<8x256xf32, #tpu.memory_space<vmem>>, vector<8x256xf32>
    %c0_1 = arith.constant 0 : index
    %c0_2 = arith.constant 0 : index
    %1 = vector.load %arg2[%c0_1, %c0_2] : memref<8x1xf32, #tpu.memory_space<vmem>>, vector<8x1xf32>
    %2 = vector.broadcast %1 : vector<8x1xf32> to vector<8x256xf32>
    %3 = arith.mulf %0, %2 : vector<8x256xf32>
    %c0_3 = arith.constant 0 : index
    %c0_4 = arith.constant 0 : index
    %4 = vector.load %arg3[%c0_3, %c0_4] : memref<8x1xf32, #tpu.memory_space<vmem>>, vector<8x1xf32>
    %5 = vector.broadcast %4 : vector<8x1xf32> to vector<8x256xf32>
    %6 = arith.addf %3, %5 : vector<8x256xf32>
    %c0_5 = arith.constant 0 : index
    %c0_6 = arith.constant 0 : index
    %7 = vector.load %arg5[%c0_5, %c0_6] : memref<8x256xf32, #tpu.memory_space<vmem>>, vector<8x256xf32>
    tpu.vector_store %arg5[%c0_5, %c0_6], %6 {strides = array<i32>} : memref<8x256xf32, #tpu.memory_space<vmem>>, vector<8x256xf32>,
    return
  }
  func.func @transform_0(%arg0: i32, %arg1: i32) -> (i32, i32) {
    %c0_i32 = arith.constant 0 : i32
    %c0_i32_0 = arith.constant 0 : i32
    return %arg0, %c0_i32 : i32, i32
  }
  func.func @transform_1(%arg0: i32, %arg1: i32) -> (i32, i32) {
    %c0_i32 = arith.constant 0 : i32
    %c0_i32_0 = arith.constant 0 : i32
    return %arg0, %c0_i32 : i32, i32
  }
  func.func @transform_2(%arg0: i32, %arg1: i32) -> (i32, i32) {
    %c0_i32 = arith.constant 0 : i32
    return %arg0, %arg1 : i32, i32
  }
  func.func @transform_3(%arg0: i32, %arg1: i32) -> (i32, i32) {
    %c0_i32 = arith.constant 0 : i32
    return %arg0, %arg1 : i32, i32
  }
}

</mosaic_0001>

<bundles_post_ra>
// kernel: tpu_custom_call.1
= control target key start
LH: loop header
LB: loop body
LE: loop exit
PB: predicated region body
PF: predicated region fallthrough
CT: control target
= control target key end

     0   :  { %v74_v1 = vmov 0   ;;  %s111_s0 = inlined_call_operand.vmem [shape: f32[8,1], index: 0, kind: input, shape index: {}]   ;;  %s112_s1 = inlined_call_operand.vmem [shape: f32[8,1], index: 1, kind: input, shape index: {}]   ;;  %s113_s2 = inlined_call_operand.vmem [shape: f32[8,256], index: 2, kind: input, shape index: {}]   ;;  %s114_s3 = inlined_call_operand.hbm [shape: f32[8,256], index: 3, kind: output, shape index: {}]  }
   0x1   :  { %v17_v0 = vld [vmem:[%s111_s0] sm:$0xff]  ;;  %51 = vset.pattern.permute.xlu0 %v74_v1 }
   0x2   :  { %8 = vsyncpa [#allocation3], 0  ;;  %20 = vperm.xlu0 %51, %v17_v0   ;;  %v25_v2 = vld [vmem:[%s112_s1] sm:$0xff]  ;;  %v16_v5 = vld [vmem:[%s113_s2 + $0x8] sm:$0xff]  ;;  %s75_s20 = smov [#allocation2]  }
   0x3   :  { %v15_v4 = vld [vmem:[%s113_s2] sm:$0xff]  ;;  %s41_s0 = sshll.u32 %s75_s20, 4  ;;  %s42_s0 = int_to_ptr.vmem [resolvable:$true] %s41_s0 }
   0x4   :  { %s52_s1 = scalar_lea.vmem %s42_s0, 256  ;;  %p57_p1 = scmp.lt.s32.totalorder %s42_s0, %s42_s0 }
   0x5   :  { %p53_p0 = scmp.ne.s32.totalorder %s42_s0, %s52_s1  ;;  %p58_p2 = scmp.lt.s32.totalorder %s52_s1, %s52_s1 }
   0x6   :  { %28 = vperm.xlu0 %51, %v25_v2  }
   0x7   :  { %p59_p3 = por %p58_p2, %p57_p1 }
   0x9   :  { %p60_p4 = pnand %p59_p3, %p53_p0 }
  0x7d   :  { %v21_v3 = vpop.permute.xlu0 %20 }
  0x7e   :  { %v23_v6 = vmul.f32 %v21_v3, %v15_v4  ;;  %v24_v7 = vmul.f32 %v21_v3, %v16_v5 }
  0x81   :  { %v29_v8 = vpop.permute.xlu0 %28 }
  0x82   :  { %v31_v9 = vadd.f32 %v29_v8, %v23_v6  ;;  %v32_v10 = vadd.f32 %v29_v8, %v24_v7 }
  0x84   :  { %33 = vst [vmem:[#allocation2] sm:$0xff] %v31_v9  ;;  %34 = vst [vmem:[#allocation2 + $0x8] sm:$0xff] %v32_v10 }
  0x85   :  { %63 = shalt.err (!%p60_p4)
}
  0x86   :  { %44 = dma.vmem_to_hbm [thread:$0]  %s42_s0, 256, %s114_s3, [#allocation3]  }
  0x87   :  { %72 = dma.done.wait [#allocation3], 256  }
  0x88   :  { %73 = vsyncadd [#allocation3], 4294967040 }
  0x89   :  { %48 = vsyncpa [#allocation3], 1 }

</bundles_post_ra>
